<compile_context>
chip_gen: v6e
topology: v6e:2x2x1
jax: 0.10.0
libtpu: 0.0.40
codegen_flags: <defaults>
</compile_context>

<pallas_src>
import functools

import jax
import jax.numpy as jnp
from jax.experimental import pallas as pl
from jax.experimental.pallas import tpu as pltpu


# ----------------------------- Pallas kernel -------------------------------

def _sigmoid(x):
    # 1 / (1 + exp(-x)); exp lowers to the EUP, divide to the VPU.
    return 1.0 / (1.0 + jnp.exp(-x))


def _decoder_kernel(emb_ref, wt_ref, b_ref, ops_ref, adj_ref):
    # emb_ref: (B, N, E)   whole batch resident in VMEM
    # wt_ref:  (E, D)      transposed Linear weight (W^T)
    # b_ref:   (1, D)      Linear bias
    # ops_ref: (B*N, D)    lane/sublane-dense output slab (reshaped in the wrapper)
    # adj_ref: (B, N, N)   reconstructed adjacency logits -> sigmoid
    emb = emb_ref[...]                                  # (B, N, E)
    B, N, E = emb.shape

    # --- ops head: fold batch into the matmul M dimension -------------------
    emb2d = emb.reshape(B * N, E)                       # (B*N, E)
    logits = jnp.dot(emb2d, wt_ref[...],
                     preferred_element_type=jnp.float32) + b_ref[...]
    ops_ref[...] = _sigmoid(logits).astype(ops_ref.dtype)

    # --- adjacency head: batched gram matrix emb @ emb^T ---------------------
    gram = jnp.einsum("bne,bme->bnm", emb, emb,
                      preferred_element_type=jnp.float32)
    adj_ref[...] = _sigmoid(gram).astype(adj_ref.dtype)


@jax.jit
def decoder_forward(embedding, w_t, bias):
    """Fused Decoder forward: returns (sigmoid(emb @ W^T + b), sigmoid(emb @ emb^T))."""
    B, N, E = embedding.shape
    D = w_t.shape[1]
    b2 = bias.reshape(1, D)

    ops_flat, adj = pl.pallas_call(
        _decoder_kernel,
        out_shape=(
            jax.ShapeDtypeStruct((B * N, D), embedding.dtype),
            jax.ShapeDtypeStruct((B, N, N), embedding.dtype),
        ),
        grid=(1,),
        in_specs=[
            pl.BlockSpec((B, N, E), lambda i: (0, 0, 0)),
            pl.BlockSpec((E, D), lambda i: (0, 0)),
            pl.BlockSpec((1, D), lambda i: (0, 0)),
        ],
        out_specs=(
            pl.BlockSpec((B * N, D), lambda i: (0, 0)),
            pl.BlockSpec((B, N, N), lambda i: (0, 0, 0)),
        ),
        compiler_params=pltpu.CompilerParams(dimension_semantics=("arbitrary",)),
    )(embedding, w_t, b2)

    return ops_flat.reshape(B, N, D), adj


# ----------------------------- Decoder module -------------------------------

class DecoderPallas:
    """JAX/Pallas port of arch2vec Decoder (inference forward)."""

    def __init__(self, embedding_dim, input_dim, dropout, key,
                 adj_hidden_dim=None, ops_hidden_dim=None):
        # adj_hidden_dim / ops_hidden_dim are stored but unused in the original forward.
        self.adj_hidden_dim = embedding_dim if adj_hidden_dim is None else adj_hidden_dim
        self.ops_hidden_dim = embedding_dim if ops_hidden_dim is None else ops_hidden_dim
        self.dropout = dropout  # identity at inference
        kw, kb = jax.random.split(key)
        bound = 1.0 / float(embedding_dim) ** 0.5       # nn.Linear-style init bound
        # Store the transposed Linear weight (E, D) so the kernel computes emb @ W^T + b.
        self.w_t = jax.random.uniform(kw, (embedding_dim, input_dim),
                                      jnp.float32, -bound, bound)
        self.b = jax.random.uniform(kb, (input_dim,), jnp.float32, -bound, bound)

    def __call__(self, embedding):
        return decoder_forward(embedding, self.w_t, self.b)


# ------------------------------- reference ----------------------------------

def _reference_forward(embedding, w_t, bias):
    ops = jnp.einsum("bne,ed->bnd", embedding, w_t) + bias
    adj = jnp.einsum("bne,bme->bnm", embedding, embedding)
    sig = lambda x: 1.0 / (1.0 + jnp.exp(-x))
    # Original module applies activation_adj (sigmoid) to both outputs.
    return sig(ops), sig(adj)


# --------------------------------- main --------------------------------------

if __name__ == "__main__":
    key = jax.random.PRNGKey(0)
    k_emb, k_params = jax.random.split(key)

    B, N = 2, 8                       # batch of small graphs, 8 nodes each
    embedding_dim, input_dim = 16, 8  # latent dim 16 -> op-feature dim 8

    embedding = jax.random.normal(k_emb, (B, N, embedding_dim), jnp.float32)

    model = DecoderPallas(embedding_dim, input_dim, dropout=0.0, key=k_params)

    ops, adj = model(embedding)
    jax.block_until_ready((ops, adj))

    ops_ref, adj_ref = _reference_forward(embedding, model.w_t, model.b)
    assert ops.shape == (B, N, input_dim) and adj.shape == (B, N, N)
    assert jnp.allclose(ops, ops_ref, atol=1e-5, rtol=1e-5)
    assert jnp.allclose(adj, adj_ref, atol=1e-5, rtol=1e-5)

    print("KERNEL_OK")
</pallas_src>

<mosaic_0001>
module attributes {stable_mosaic.version = 11 : i64} {
  func.func @_decoder_kernel(%arg0: i32, %arg1: memref<2x8x16xf32, #tpu.memory_space<vmem>>, %arg2: memref<16x8xf32, #tpu.memory_space<vmem>>, %arg3: memref<1x8xf32, #tpu.memory_space<vmem>>, %arg4: memref<16x8xf32, #tpu.memory_space<vmem>>, %arg5: memref<2x8x8xf32, #tpu.memory_space<vmem>>) attributes {dimension_semantics = [#tpu.dimension_semantics<arbitrary>], iteration_bounds = array<i64: 1>, scalar_prefetch = 0 : i64, scratch_operands = 0 : i64, tpu.core_type = #tpu.core_type<tc>, window_params = [{pipeline_mode = #tpu.pipeline_mode<synchronous>, transform_indices = @transform_0, window_bounds = array<i64: 2, 8, 16>}, {pipeline_mode = #tpu.pipeline_mode<synchronous>, transform_indices = @transform_1, window_bounds = array<i64: 16, 8>}, {pipeline_mode = #tpu.pipeline_mode<synchronous>, transform_indices = @transform_2, window_bounds = array<i64: 1, 8>}, {pipeline_mode = #tpu.pipeline_mode<synchronous>, transform_indices = @transform_3, window_bounds = array<i64: 16, 8>}, {pipeline_mode = #tpu.pipeline_mode<synchronous>, transform_indices = @transform_4, window_bounds = array<i64: 2, 8, 8>}]} {
    %c0 = arith.constant 0 : index
    %c0_0 = arith.constant 0 : index
    %c0_1 = arith.constant 0 : index
    %0 = vector.load %arg1[%c0, %c0_0, %c0_1] : memref<2x8x16xf32, #tpu.memory_space<vmem>>, vector<2x8x16xf32>
    %1 = vector.shape_cast %0 : vector<2x8x16xf32> to vector<16x16xf32>
    %c0_2 = arith.constant 0 : index
    %c0_3 = arith.constant 0 : index
    %2 = vector.load %arg2[%c0_2, %c0_3] : memref<16x8xf32, #tpu.memory_space<vmem>>, vector<16x8xf32>
    %cst = arith.constant dense<0.000000e+00> : vector<16x8xf32>
    %3 = tpu.matmul %1, %2, %cst {dimension_numbers = #tpu.dot_dimension_numbers<[1], [0], [0], [1], [0, 0, 1, 1], [], []>} : vector<16x16xf32>, vector<16x8xf32>, vector<16x8xf32> -> vector<16x8xf32>
    %c0_4 = arith.constant 0 : index
    %c0_5 = arith.constant 0 : index
    %4 = vector.load %arg3[%c0_4, %c0_5] : memref<1x8xf32, #tpu.memory_space<vmem>>, vector<1x8xf32>
    %5 = vector.broadcast %4 : vector<1x8xf32> to vector<16x8xf32>
    %6 = arith.addf %3, %5 : vector<16x8xf32>
    %cst_6 = arith.constant 0.000000e+00 : f32
    %7 = vector.broadcast %cst_6 : f32 to vector<16x8xf32>
    %8 = arith.subf %7, %6 : vector<16x8xf32>
    %9 = math.exp %8 : vector<16x8xf32>
    %cst_7 = arith.constant 1.000000e+00 : f32
    %10 = vector.broadcast %cst_7 : f32 to vector<16x8xf32>
    %11 = arith.addf %10, %9 : vector<16x8xf32>
    %cst_8 = arith.constant 1.000000e+00 : f32
    %12 = vector.broadcast %cst_8 : f32 to vector<16x8xf32>
    %13 = arith.divf %12, %11 : vector<16x8xf32>
    %c0_9 = arith.constant 0 : index
    %c0_10 = arith.constant 0 : index
    %14 = vector.load %arg4[%c0_9, %c0_10] : memref<16x8xf32, #tpu.memory_space<vmem>>, vector<16x8xf32>
    tpu.vector_store %arg4[%c0_9, %c0_10], %13 {strides = array<i32>} : memref<16x8xf32, #tpu.memory_space<vmem>>, vector<16x8xf32>,
    "tpu.trace_start"() <{level = 10 : i32, message = "bne,bme->bnm"}> : () -> ()
    %cst_11 = arith.constant dense<0.000000e+00> : vector<2x8x8xf32>
    %15 = tpu.matmul %0, %0, %cst_11 {dimension_numbers = #tpu.dot_dimension_numbers<[2], [2], [1], [1], [0, 0, 0, 1, 1, 1], [0], [0]>} : vector<2x8x16xf32>, vector<2x8x16xf32>, vector<2x8x8xf32> -> vector<2x8x8xf32>
    "tpu.trace_stop"() : () -> ()
    %cst_12 = arith.constant 0.000000e+00 : f32
    %16 = vector.broadcast %cst_12 : f32 to vector<2x8x8xf32>
    %17 = arith.subf %16, %15 : vector<2x8x8xf32>
    %18 = math.exp %17 : vector<2x8x8xf32>
    %cst_13 = arith.constant 1.000000e+00 : f32
    %19 = vector.broadcast %cst_13 : f32 to vector<2x8x8xf32>
    %20 = arith.addf %19, %18 : vector<2x8x8xf32>
    %cst_14 = arith.constant 1.000000e+00 : f32
    %21 = vector.broadcast %cst_14 : f32 to vector<2x8x8xf32>
    %22 = arith.divf %21, %20 : vector<2x8x8xf32>
    %c0_15 = arith.constant 0 : index
    %c0_16 = arith.constant 0 : index
    %c0_17 = arith.constant 0 : index
    %23 = vector.load %arg5[%c0_15, %c0_16, %c0_17] : memref<2x8x8xf32, #tpu.memory_space<vmem>>, vector<2x8x8xf32>
    tpu.vector_store %arg5[%c0_15, %c0_16, %c0_17], %22 {strides = array<i32>} : memref<2x8x8xf32, #tpu.memory_space<vmem>>, vector<2x8x8xf32>,
    return
  }
  func.func @transform_0(%arg0: i32) -> (i32, i32, i32) {
    %c0_i32 = arith.constant 0 : i32
    %c0_i32_0 = arith.constant 0 : i32
    %c0_i32_1 = arith.constant 0 : i32
    %c0_i32_2 = arith.constant 0 : i32
    return %c0_i32, %c0_i32_0, %c0_i32_1 : i32, i32, i32
  }
  func.func @transform_1(%arg0: i32) -> (i32, i32) {
    %c0_i32 = arith.constant 0 : i32
    %c0_i32_0 = arith.constant 0 : i32
    %c0_i32_1 = arith.constant 0 : i32
    return %c0_i32, %c0_i32_0 : i32, i32
  }
  func.func @transform_2(%arg0: i32) -> (i32, i32) {
    %c0_i32 = arith.constant 0 : i32
    %c0_i32_0 = arith.constant 0 : i32
    %c0_i32_1 = arith.constant 0 : i32
    return %c0_i32, %c0_i32_0 : i32, i32
  }
  func.func @transform_3(%arg0: i32) -> (i32, i32) {
    %c0_i32 = arith.constant 0 : i32
    %c0_i32_0 = arith.constant 0 : i32
    %c0_i32_1 = arith.constant 0 : i32
    return %c0_i32, %c0_i32_0 : i32, i32
  }
  func.func @transform_4(%arg0: i32) -> (i32, i32, i32) {
    %c0_i32 = arith.constant 0 : i32
    %c0_i32_0 = arith.constant 0 : i32
    %c0_i32_1 = arith.constant 0 : i32
    %c0_i32_2 = arith.constant 0 : i32
    return %c0_i32, %c0_i32_0, %c0_i32_1 : i32, i32, i32
  }
}

</mosaic_0001>

<bundles_post_ra>
// kernel: decoder_forward.1
= control target key start
LH: loop header
LB: loop body
LE: loop exit
PB: predicated region body
PF: predicated region fallthrough
CT: control target
= control target key end

     0   :  { %10 = vsyncpa [#allocation3], 0  ;;  %vm29_vm0 = vcmask 130048   ;;  %s472_s0 = inlined_call_operand.vmem [shape: f32[2,8,16], index: 0, kind: input, shape index: {}]   ;;  %s473_s1 = inlined_call_operand.vmem [shape: f32[16,8], index: 1, kind: input, shape index: {}]   ;;  %s474_s2 = inlined_call_operand.vmem [shape: f32[1,8], index: 2, kind: input, shape index: {}]   ;;  %s475_s3 = inlined_call_operand.hbm [shape: f32[16,8], index: 3, kind: output, shape index: {0}]   ;;  %s476_s4 = inlined_call_operand.hbm [shape: f32[2,8,8], index: 4, kind: output, shape index: {1}]  }
   0x1   :  { %v21_v0 = vld [vmem:[%s473_s1 + $0x8] sm:$0xff]  ;;  %v20_v1 = vld [vmem:[%s473_s1] sm:$0xff] }
   0x2   :  { %v18_v2 = vld [vmem:[%s472_s0] sm:$0xff]  ;;  %327 = vmatprep.subr.mxu0 %v21_v0 }
   0x3   :  { %331 = vmatprep.mubr.msk.f32.mxu0 %vm29_vm0, %v18_v2 }
   0x4   :  { %11 = vsyncpa [#allocation5], 0  ;;  %328 = vmatpush3.msra.mxu0 %v21_v0  ;;  %v410_v3 = vmov 0.0   ;;  %v19_v4 = vld [vmem:[%s472_s0 + $0x8] sm:$0xff]  ;;  %vm411_vm1 = vmmov 0   ;;  %vm123_vm2 = vcmask 64512  }
   0x5   :  { %334 = vmatprep.subr.mxu1 %v410_v3  ;;  %329 = vmatprep.subr.mxu0 %v20_v1  ;;  %v312_v5 = vld [vmem:[%s474_s2] ss:$0 sm:$0xff]  ;;  %s412_s0 = smov [#allocation2]   ;;  %s413_s24 = smov [#allocation4]  }
   0x6   :  { %335 = vmatpush3.xpose.msk.msra.mxu1 %vm29_vm0, %v18_v2  ;;  %330 = vmatpush3.msra.mxu0 %v20_v1  ;;  %s285_s2 = sshll.u32 %s412_s0, 4  ;;  %s297_s25 = sshll.u32 %s413_s24, 4  ;;  %s286_s2 = int_to_ptr.vmem [resolvable:$true] %s285_s2  ;;  %s298_s25 = int_to_ptr.vmem [resolvable:$true] %s297_s25 }
   0x7   :  { %336 = vmatprep.mubr.msk.f32.mxu1 %vm411_vm1, %v410_v3  ;;  %332 = vmatmul.mubr.msk.f32.vlgmr.msra.gmra.mxu0 %vm29_vm0, %v19_v4  ;;  %s366_s26 = scalar_lea.vmem %s286_s2, 256  ;;  %p371_p1 = scmp.lt.s32.totalorder %s286_s2, %s286_s2 }
   0x8   :  { %339 = vmatprep.subr.mxu0 %v410_v3  ;;  %341 = vmatprep.mubr.msk.f32.mxu0 %vm411_vm1, %v410_v3  ;;  %p367_p0 = scmp.ne.s32.totalorder %s286_s2, %s366_s26  ;;  %p372_p2 = scmp.lt.s32.totalorder %s366_s26, %s366_s26 }
   0x9   :  { %340 = vmatpush3.xpose.msk.msra.mxu0 %vm29_vm0, %v19_v4  ;;  %337 = vmatmul.mubr.msk.f32.vlgmr.msra.gmra.mxu1 %vm29_vm0, %v18_v2 }
   0xa   :  { %p373_p3 = por %p372_p2, %p371_p1 }
   0xc   :  { %342 = vmatmul.mubr.msk.f32.vlgmr.msra.gmra.mxu0 %vm29_vm0, %v19_v4  ;;  %p374_p4 = pnand %p373_p3, %p367_p0 }
  0xc7   :  { %v333_v6 = vpop.f32.mrf.mxu0 }
  0xc8   :  { %v108_v7 = vadd.f32 %v333_v6, %v312_v5 }
  0xc9   :  { %v192_v8 = vpop.f32.mrf.mxu1  ;;  %v102_v9 = vpop.f32.mrf.mxu0 }
  0xca   :  { %v266_v10 = vsub.f32 0.0, %v192_v8  ;;  %v112_v11 = vsub.f32 0.0, %v108_v7  ;;  %v103_v12 = vadd.f32 %v312_v5, %v102_v9 }
  0xcb   :  { %v338_v13 = vpop.f32.mrf.mxu1 }
  0xcc   :  { %v268_v14 = vmul.f32 1.442695, %v266_v10  ;;  %v262_v15 = vpop.f32.mrf.mxu0  ;;  %v115_v16 = vmul.f32 1.442695, %v112_v11  ;;  %v111_v17 = vsub.f32 0.0, %v103_v12 }
  0xcd   :  { %v267_v18 = vsub.f32 0.0, %v262_v15 }
  0xce   :  { %350 = vpow2.f32 %v268_v14  ;;  %v343_v19 = vpop.f32.mrf.mxu0  ;;  %v113_v20 = vmul.f32 1.442695, %v111_v17 }
  0xcf   :  { %352 = vpow2.f32 %v115_v16  ;;  %v270_v21 = vmul.f32 1.442695, %v267_v18 }
  0xd0   :  { %354 = vpow2.f32 %v113_v20 }
  0xd1   :  { %356 = vpow2.f32 %v270_v21 }
  0xdb   :  { %v351_v22 = vpop.eup %350 }
  0xdc   :  { %v353_v23 = vpop.eup %352  ;;  %v272_v24 = vadd.f32 1.0, %v351_v22 }
  0xdd   :  { %v118_v25 = vadd.f32 1.0, %v353_v23  ;;  %v355_v26 = vpop.eup %354 }
  0xde   :  { %358 = vrcp.f32 %v272_v24  ;;  %v357_v27 = vpop.eup %356  ;;  %v117_v28 = vadd.f32 1.0, %v355_v26 }
  0xdf   :  { %360 = vrcp.f32 %v118_v25  ;;  %v273_v29 = vadd.f32 1.0, %v357_v27 }
  0xe0   :  { %362 = vrcp.f32 %v117_v28 }
  0xe1   :  { %364 = vrcp.f32 %v273_v29 }
  0xeb   :  { %v359_v30 = vpop.eup %358 }
  0xec   :  { %v361_v31 = vpop.eup %360  ;;  %278 = vst.msk [vmem:[#allocation4] sm:$0xff] %vm123_vm2, %v359_v30 }
  0xed   :  { %125 = vst.msk [vmem:[#allocation2 + $0x8] sm:$0xff] %vm123_vm2, %v361_v31  ;;  %v363_v32 = vpop.eup %362 }
  0xee   :  { %v365_v33 = vpop.eup %364  ;;  %124 = vst.msk [vmem:[#allocation2] sm:$0xff] %vm123_vm2, %v363_v32 }
  0xef   :  { %377 = shalt.err (!%p374_p4)
}
  0xf0   :  { %s414_s27 = smov 128   ;;  %s415_s28 = smov 8   ;;  %279 = vst.msk [vmem:[#allocation4 + $0x8] sm:$0xff] %vm123_vm2, %v365_v33 }
  0xf1   :  { %291 = dma.vmem_to_hbm [thread:$0]  %s286_s2, 256, %s475_s3, [#allocation3], %s414_s27, %s414_s27, %s415_s28  }
  0xf2   :  { %s386_s5 = scalar_lea.vmem %s298_s25, 256  ;;  %p391_p6 = scmp.lt.s32.totalorder %s298_s25, %s298_s25 }
  0xf3   :  { %p387_p5 = scmp.ne.s32.totalorder %s298_s25, %s386_s5  ;;  %p392_p7 = scmp.lt.s32.totalorder %s386_s5, %s386_s5 }
  0xf5   :  { %p393_p8 = por %p392_p7, %p391_p6 }
  0xf7   :  { %p394_p9 = pnand %p393_p8, %p387_p5 }
  0xf9   :  { %397 = shalt.err (!%p394_p9)
}
  0xfa   :  { %303 = dma.vmem_to_hbm [thread:$0]  %s298_s25, 256, %s476_s4, [#allocation5], %s414_s27, %s414_s27, %s415_s28  }
  0xfb   :  { %406 = dma.done.wait [#allocation3], 256  }
  0xfc   :  { %407 = vsyncadd [#allocation3], 4294967040 }
  0xfd   :  { %408 = dma.done.wait [#allocation5], 256  }
  0xfe   :  { %409 = vsyncadd [#allocation5], 4294967040 }
  0xff   :  { %310 = vsyncpa [#allocation3], 1 }
 0x100   :  { %311 = vsyncpa [#allocation5], 1 }

</bundles_post_ra>
